<compile_context>
chip_gen: v7x
topology: tpu7x:2x2x1
jax: 0.10.0
libtpu: 0.0.40
codegen_flags: <defaults>
</compile_context>

<pallas_src>
from functools import partial

import jax
import jax.numpy as jnp
import numpy as np
from jax.experimental import pallas as pl
from jax.experimental.pallas import tpu as pltpu


def _make_rope_tables(dim, patch_seq_length=16, feature_seq_length=None, base=10000.0):
    """Deterministic buffers matching the PyTorch __init__ exactly."""
    if feature_seq_length is None:
        feature_seq_length = patch_seq_length
    tokens = (jnp.arange(feature_seq_length, dtype=jnp.float32)
              / feature_seq_length * patch_seq_length)                        # (N,)
    theta = 1.0 / base ** (2.0 / dim * jnp.arange(0, dim // 2, dtype=jnp.float32))
    theta = jnp.repeat(theta, 2)                                              # (C,) repeat_interleave(2)
    idx_theta = tokens[:, None] * theta[None, :]                              # (N, C)
    return jnp.cos(idx_theta), jnp.sin(idx_theta)


def _rope_kernel(x_ref, cos_ref, sina_ref, sinb_ref, o_ref, *, xlu_roll):
    # x_ref / o_ref: (TM, TNC) tile.  cos/sina/sinb: (1, TNC) tables.
    x = x_ref[...]
    nc = x.shape[1]
    if xlu_roll:
        # XLU lane rotations (static non-negative shift, positive axis) — stay
        # off the load/store slots, fuse under the HBM stream.
        x_next = pltpu.roll(x, shift=nc - 1, axis=1)   # x_next[:, j] = x[:, (j + 1) % nc]
        x_prev = pltpu.roll(x, shift=1, axis=1)        # x_prev[:, j] = x[:, (j - 1) % nc]
    else:
        # Fallback for lane extents that are not a multiple of 128.
        x_next = jnp.roll(x, -1, axis=1)
        x_prev = jnp.roll(x, 1, axis=1)
    # Wrap-around lanes hit the zeros baked into sin_a / sin_b, so no masking.
    out = x * cos_ref[...] + x_next * sina_ref[...] + x_prev * sinb_ref[...]
    o_ref[...] = out.astype(o_ref.dtype)


def _cdiv(a, b):
    return -(-a // b)


def _round_up(v, m):
    return _cdiv(v, m) * m


def _chip_profile():
    """Generation-aware tiling knobs (conservative fallback if unknown)."""
    kind = ""
    try:
        dev = jax.devices()[0]
        if dev.platform == "tpu":
            kind = dev.device_kind.lower()
    except Exception:
        pass
    if "7" in kind:        # v7x: 2 TensorCores, 64 MiB VMEM/TC, ~3.2 TB/s HBM
        return dict(block_bytes=5 << 20, two_cores=True, bf16_vpu=True)
    if "v6" in kind:       # v6e: 1 TC, 128 MiB VMEM, ~1.4 TB/s HBM
        return dict(block_bytes=4 << 20, two_cores=False, bf16_vpu=True)
    # v5e / older / unknown: conservative (16 MiB scoped-VMEM default, 1 TC)
    return dict(block_bytes=2 << 20, two_cores=False, bf16_vpu=False)


def _pick_tiles(m, nc, itemsize, *, block_bytes, two_cores, sub):
    """Returns (rows, lanes) per block."""
    # Lane-axis block: keep the full N*C whenever a minimal-height tile fits
    # the byte budget; otherwise pick an (even) multiple of 128 that divides
    # N*C.  No halo is needed: the roll wrap at block edges lands on
    # pair-boundary lanes where the sin_a / sin_b tables are zero.
    tnc = nc
    if sub * nc * itemsize > block_bytes and nc % 128 == 0:
        blk = max(128, (block_bytes // (sub * itemsize)) // 128 * 128)
        while blk > 128 and nc % blk:
            blk -= 128
        if nc % blk == 0:
            tnc = blk
    # Row block from the byte budget, rounded to the packed-sublane multiple.
    rows = max(sub, (block_bytes // max(1, tnc * itemsize)) // sub * sub)
    if rows >= m:
        if two_cores and m >= 2 * sub:
            rows = _round_up(_cdiv(m, 2), sub)       # one block per TensorCore
        else:
            rows = m                                 # single full block (always legal)
    elif two_cores:
        nblk = _cdiv(m, rows)
        nblk += nblk % 2                             # even block count: balanced TCs
        rows = max(sub, _round_up(_cdiv(m, nblk), sub))
    return int(rows), int(tnc)


def vision_rope(x, freqs_cos, freqs_sin):
    """x: (B, H, N, C) -> (B, H, N, C), identical to the torch forward."""
    B, H, N, C = x.shape
    assert C % 2 == 0, "head dim must be even for interleaved RoPE pairs"
    M, NC = B * H, N * C

    prof = _chip_profile()
    itemsize = jnp.dtype(x.dtype).itemsize
    sub = max(8, 32 // max(1, itemsize))             # dtype-aware sublane multiple
    tm, tnc = _pick_tiles(M, NC, itemsize,
                          block_bytes=prof["block_bytes"],
                          two_cores=prof["two_cores"], sub=sub)

    # --- parameter glue (would be precomputed once at module init) ----------
    table_dtype = (jnp.bfloat16
                   if (x.dtype == jnp.bfloat16 and prof["bf16_vpu"])
                   else jnp.float32)
    cos_t = freqs_cos.astype(jnp.float32).reshape(1, NC).astype(table_dtype)
    sin2 = freqs_sin.astype(jnp.float32).reshape(N, C // 2, 2)
    zero = jnp.zeros_like(sin2[..., 0])
    # sin_a multiplies x[j+1]; active on even lanes:  sin_a[2k]   = -sin[2k+1]
    sin_a = jnp.stack([-sin2[..., 1], zero], axis=-1).reshape(1, NC).astype(table_dtype)
    # sin_b multiplies x[j-1]; active on odd  lanes:  sin_b[2k+1] =  sin[2k]
    sin_b = jnp.stack([zero, sin2[..., 0]], axis=-1).reshape(1, NC).astype(table_dtype)

    xm = x.reshape(M, NC)                            # zero-cost contiguous reshape
    grid = (pl.cdiv(M, tm), pl.cdiv(NC, tnc))

    # VMEM working set: double-buffered x + out tiles plus the tiny tables;
    # pass it explicitly so wide-row configs don't silently blow the scoped
    # default (esp. v5e's 16 MiB).
    tile_bytes = tm * tnc * itemsize
    table_bytes = 8 * tnc * jnp.dtype(table_dtype).itemsize
    need = 4 * tile_bytes + 6 * table_bytes
    vmem_limit = int(min(max(need + (8 << 20), 12 << 20), 56 << 20))

    cost = pl.CostEstimate(
        flops=5 * M * NC,                            # 3 mul + 2 add per element
        transcendentals=0,
        bytes_accessed=2 * M * NC * itemsize + 3 * NC * jnp.dtype(table_dtype).itemsize,
    )

    out = pl.pallas_call(
        partial(_rope_kernel, xlu_roll=(tnc % 128 == 0)),
        out_shape=jax.ShapeDtypeStruct((M, NC), x.dtype),
        grid=grid,
        in_specs=[
            pl.BlockSpec((tm, tnc), lambda i, j: (i, j)),   # streaming x tile
            pl.BlockSpec((1, tnc), lambda i, j: (0, j)),    # cos
            pl.BlockSpec((1, tnc), lambda i, j: (0, j)),    # sin_a
            pl.BlockSpec((1, tnc), lambda i, j: (0, j)),    # sin_b
        ],
        out_specs=pl.BlockSpec((tm, tnc), lambda i, j: (i, j)),
        compiler_params=pltpu.CompilerParams(
            dimension_semantics=("parallel", "parallel"),
            vmem_limit_bytes=vmem_limit,
        ),
        cost_estimate=cost,
    )(xm, cos_t, sin_a, sin_b)
    return out.reshape(B, H, N, C)


if __name__ == "__main__":
    # dim = C = 32, feature_seq_length = N = 16 (matches module defaults scale)
    B, H, N, C = 2, 4, 16, 32
    key = jax.random.PRNGKey(0)
    x = jax.random.normal(key, (B, H, N, C), dtype=jnp.float32)

    freqs_cos, freqs_sin = _make_rope_tables(dim=C, patch_seq_length=16, feature_seq_length=N)

    out = vision_rope(x, freqs_cos, freqs_sin)
    out = jax.block_until_ready(out)

    # Pure-JAX reference mirroring the PyTorch forward exactly.
    cos_x = x * freqs_cos
    sin_x = x * freqs_sin
    sin_rot = jnp.stack([-sin_x[..., 1::2], sin_x[..., ::2]], axis=-1).reshape(x.shape)
    ref = cos_x + sin_rot

    np.testing.assert_allclose(np.asarray(out), np.asarray(ref), rtol=1e-6, atol=1e-6)
    print("KERNEL_OK")
</pallas_src>

<mosaic_0001>
module attributes {stable_mosaic.version = 11 : i64} {
  func.func @_rope_kernel(%arg0: i32, %arg1: i32, %arg2: memref<8x512xf32, #tpu.memory_space<vmem>>, %arg3: memref<1x512xf32, #tpu.memory_space<vmem>>, %arg4: memref<1x512xf32, #tpu.memory_space<vmem>>, %arg5: memref<1x512xf32, #tpu.memory_space<vmem>>, %arg6: memref<8x512xf32, #tpu.memory_space<vmem>>) attributes {dimension_semantics = [#tpu.dimension_semantics<parallel>, #tpu.dimension_semantics<parallel>], iteration_bounds = array<i64: 1, 1>, scalar_prefetch = 0 : i64, scratch_operands = 0 : i64, tpu.core_type = #tpu.core_type<tc>, window_params = [{transform_indices = @transform_0, window_bounds = array<i64: 8, 512>}, {transform_indices = @transform_1, window_bounds = array<i64: 1, 512>}, {transform_indices = @transform_2, window_bounds = array<i64: 1, 512>}, {transform_indices = @transform_3, window_bounds = array<i64: 1, 512>}, {transform_indices = @transform_4, window_bounds = array<i64: 8, 512>}]} {
    %c0 = arith.constant 0 : index
    %c0_0 = arith.constant 0 : index
    %0 = vector.load %arg2[%c0, %c0_0] : memref<8x512xf32, #tpu.memory_space<vmem>>, vector<8x512xf32>
    %c511_i32 = arith.constant 511 : i32
    %1 = tpu.dynamic_rotate %0 by %c511_i32 dim 1 : vector<8x512xf32>, i32 -> vector<8x512xf32>
    %c1_i32 = arith.constant 1 : i32
    %2 = tpu.dynamic_rotate %0 by %c1_i32 dim 1 : vector<8x512xf32>, i32 -> vector<8x512xf32>
    %c0_1 = arith.constant 0 : index
    %c0_2 = arith.constant 0 : index
    %3 = vector.load %arg3[%c0_1, %c0_2] : memref<1x512xf32, #tpu.memory_space<vmem>>, vector<1x512xf32>
    %4 = vector.broadcast %3 : vector<1x512xf32> to vector<8x512xf32>
    %5 = arith.mulf %0, %4 : vector<8x512xf32>
    %c0_3 = arith.constant 0 : index
    %c0_4 = arith.constant 0 : index
    %6 = vector.load %arg4[%c0_3, %c0_4] : memref<1x512xf32, #tpu.memory_space<vmem>>, vector<1x512xf32>
    %7 = vector.broadcast %6 : vector<1x512xf32> to vector<8x512xf32>
    %8 = arith.mulf %1, %7 : vector<8x512xf32>
    %9 = arith.addf %5, %8 : vector<8x512xf32>
    %c0_5 = arith.constant 0 : index
    %c0_6 = arith.constant 0 : index
    %10 = vector.load %arg5[%c0_5, %c0_6] : memref<1x512xf32, #tpu.memory_space<vmem>>, vector<1x512xf32>
    %11 = vector.broadcast %10 : vector<1x512xf32> to vector<8x512xf32>
    %12 = arith.mulf %2, %11 : vector<8x512xf32>
    %13 = arith.addf %9, %12 : vector<8x512xf32>
    %c0_7 = arith.constant 0 : index
    %c0_8 = arith.constant 0 : index
    %14 = vector.load %arg6[%c0_7, %c0_8] : memref<8x512xf32, #tpu.memory_space<vmem>>, vector<8x512xf32>
    tpu.vector_store %arg6[%c0_7, %c0_8], %13 {strides = array<i32>} : memref<8x512xf32, #tpu.memory_space<vmem>>, vector<8x512xf32>,
    return
  }
  func.func @transform_0(%arg0: i32, %arg1: i32) -> (i32, i32) {
    %c0_i32 = arith.constant 0 : i32
    return %arg0, %arg1 : i32, i32
  }
  func.func @transform_1(%arg0: i32, %arg1: i32) -> (i32, i32) {
    %c0_i32 = arith.constant 0 : i32
    %c0_i32_0 = arith.constant 0 : i32
    return %c0_i32, %arg1 : i32, i32
  }
  func.func @transform_2(%arg0: i32, %arg1: i32) -> (i32, i32) {
    %c0_i32 = arith.constant 0 : i32
    %c0_i32_0 = arith.constant 0 : i32
    return %c0_i32, %arg1 : i32, i32
  }
  func.func @transform_3(%arg0: i32, %arg1: i32) -> (i32, i32) {
    %c0_i32 = arith.constant 0 : i32
    %c0_i32_0 = arith.constant 0 : i32
    return %c0_i32, %arg1 : i32, i32
  }
  func.func @transform_4(%arg0: i32, %arg1: i32) -> (i32, i32) {
    %c0_i32 = arith.constant 0 : i32
    return %arg0, %arg1 : i32, i32
  }
}

</mosaic_0001>

<bundles_post_ra>
// kernel: tpu_custom_call.1
= control target key start
LH: loop header
LB: loop body
LE: loop exit
PB: predicated region body
PF: predicated region fallthrough
CT: control target
= control target key end

     0   :  { %9 = vsyncpa [#allocation3], 0  ;;  %s337_s0 = inlined_call_operand.hbm [shape: f32[8,512], index: 0, kind: input, shape index: {}]   ;;  %s338_s1 = inlined_call_operand.hbm [shape: f32[1,512], index: 1, kind: input, shape index: {}]   ;;  %s339_s2 = inlined_call_operand.vmem [shape: f32[1,512], index: 2, kind: input, shape index: {}]   ;;  %s340_s3 = inlined_call_operand.vmem [shape: f32[1,512], index: 3, kind: input, shape index: {}]   ;;  %s341_s4 = inlined_call_operand.hbm [shape: f32[8,512], index: 4, kind: output, shape index: {}]  }
   0x1   :  { %10 = vsyncpa [#allocation6], 0 }
   0x2   :  { %11 = vsyncpa [#allocation4], 0  ;;  %s257_s15 = smov [#allocation2]   ;;  %s258_s17 = smov [#allocation5]  }
   0x3   :  { %s18_s16 = sshll.u32 %s257_s15, 4  ;;  %s28_s18 = sshll.u32 %s258_s17, 4  ;;  %s19_s16 = int_to_ptr.vmem [resolvable:$true] %s18_s16  ;;  %s29_s18 = int_to_ptr.vmem [resolvable:$true] %s28_s18 }
   0x4   :  { %s185_s21 = scalar_lea.hbm %s337_s0, 512 }
   0x5   :  { %p186_p0 = scmp.ne.s32.totalorder %s337_s0, %s185_s21  ;;  %p189_p1 = scmp.lt.u32.totalorder %s185_s21, %s337_s0 }
   0x7   :  { %p191_p2 = pnand %p189_p1, %p186_p0 }
   0x9   :  { %194 = shalt.err (!%p191_p2)
}
   0xa   :  { %s195_s26 = scalar_lea.vmem %s19_s16, 512  ;;  %p200_p4 = scmp.lt.s32.totalorder %s19_s16, %s19_s16 }
   0xb   :  { %p196_p3 = scmp.ne.s32.totalorder %s19_s16, %s195_s26  ;;  %p201_p5 = scmp.lt.s32.totalorder %s195_s26, %s195_s26 }
   0xd   :  { %p202_p6 = por %p201_p5, %p200_p4 }
   0xf   :  { %p203_p7 = pnand %p202_p6, %p196_p3 }
  0x11   :  { %206 = shalt.err (!%p203_p7)
}
  0x12   :  { %21 = dma.hbm_to_vmem [thread:$0]  %s337_s0, 512, %s19_s16, [#allocation3]  }
  0x13   :  { %s207_s5 = scalar_lea.hbm %s338_s1, 64 }
  0x14   :  { %p208_p8 = scmp.ne.s32.totalorder %s338_s1, %s207_s5  ;;  %p211_p9 = scmp.lt.u32.totalorder %s207_s5, %s338_s1 }
  0x16   :  { %p213_p10 = pnand %p211_p9, %p208_p8 }
  0x18   :  { %216 = shalt.err (!%p213_p10)
}
  0x19   :  { %s217_s10 = scalar_lea.vmem %s29_s18, 64  ;;  %p222_p12 = scmp.lt.s32.totalorder %s29_s18, %s29_s18 }
  0x1a   :  { %p218_p11 = scmp.ne.s32.totalorder %s29_s18, %s217_s10  ;;  %p223_p13 = scmp.lt.s32.totalorder %s217_s10, %s217_s10 }
  0x1c   :  { %p224_p0 = por %p223_p13, %p222_p12 }
  0x1e   :  { %p225_p1 = pnand %p224_p0, %p218_p11 }
  0x20   :  { %228 = shalt.err (!%p225_p1)
}
  0x21   :  { %31 = dma.hbm_to_vmem [thread:$0]  %s338_s1, 64, %s29_s18, [#allocation6]  }
  0x22   :  { %251 = dma.done.wait [#allocation3], 512  }
  0x23   :  { %252 = vsyncadd [#allocation3], 4294966784 }
  0x24   :  { %253 = dma.done.wait [#allocation6], 64  }
  0x25   :  { %254 = vsyncadd [#allocation6], 4294967232  ;;  %v44_v0 = vld [vmem:[#allocation2 + $0x10] sm:$0xff]  ;;  %v42_v1 = vld [vmem:[#allocation2] sm:$0xff]  ;;  %s259_s12 = smov 127   ;;  %s260_s13 = smov 1   ;;  %v54_v4 = vlaneseq }
  0x26   :  { %50 = vrot.lane.b32.xlu1 %v44_v0, %s259_s12  ;;  %46 = vrot.lane.b32.xlu0 %v42_v1, %s259_s12  ;;  %v45_v2 = vld [vmem:[#allocation2 + $0x18] sm:$0xff]  ;;  %v43_v3 = vld [vmem:[#allocation2 + $0x8] sm:$0xff]  ;;  %v74_v8 = vld [vmem:[#allocation5] sm:$0xf] }
  0x27   :  { %v77_v5 = vshrl.u32 %v54_v4, 7  ;;  %v55_v7 = vand.u32 127, %v54_v4  ;;  %v100_v9 = vld [vmem:[%s339_s2] sm:$0xf]  ;;  %s261_s2 = smov [#allocation7]  }
  0x28   :  { %v130_v17 = vld [vmem:[%s340_s3] sm:$0xf]  ;;  %s170_s3 = sshll.u32 %s261_s2, 4  ;;  %s171_s3 = int_to_ptr.vmem [resolvable:$true] %s170_s3 }
  0x29   :  { %v82_v6 = vsub.s32 1, %v77_v5  ;;  %v86_v10 = vsub.s32 2, %v77_v5  ;;  %v78_v11 = vsub.s32 0, %v77_v5  ;;  %v90_v12 = vsub.s32 3, %v77_v5  ;;  %s229_s17 = scalar_lea.vmem %s171_s3, 512  ;;  %p234_p3 = scmp.lt.s32.totalorder %s171_s3, %s171_s3 }
  0x2a   :  { %52 = vrot.lane.b32.xlu1 %v45_v2, %s259_s12  ;;  %48 = vrot.lane.b32.xlu0 %v43_v3, %s259_s12  ;;  %vm56_vm0 = vcmp.lt.s32.totalorder %v55_v7, 127  ;;  %vm69_vm1 = vcmp.lt.s32.totalorder %v55_v7, 1  ;;  %p230_p2 = scmp.ne.s32.totalorder %s171_s3, %s229_s17  ;;  %p235_p4 = scmp.lt.s32.totalorder %s229_s17, %s229_s17 }
  0x2b   :  { %v83_v15 = vrot.slane %v74_v8, %v82_v6  ;;  %v109_v16 = vrot.slane %v100_v9, %v82_v6  ;;  %v87_v18 = vrot.slane %v74_v8, %v86_v10  ;;  %v79_v19 = vrot.slane %v74_v8, %v78_v11 }
  0x2c   :  { %v91_v20 = vrot.slane %v74_v8, %v90_v12  ;;  %v113_v21 = vrot.slane %v100_v9, %v86_v10  ;;  %v117_v24 = vrot.slane %v100_v9, %v90_v12  ;;  %v105_v26 = vrot.slane %v100_v9, %v78_v11  ;;  %p236_p5 = por %p235_p4, %p234_p3 }
  0x2d   :  { %v97_v28 = vmul.f32 %v83_v15, %v43_v3  ;;  %v139_v31 = vrot.slane %v130_v17, %v82_v6  ;;  %v98_v33 = vmul.f32 %v87_v18, %v44_v0  ;;  %v96_v34 = vmul.f32 %v79_v19, %v42_v1 }
  0x2e   :  { %63 = vrot.lane.b32.xlu1 %v43_v3, %s260_s13  ;;  %61 = vrot.lane.b32.xlu0 %v42_v1, %s260_s13  ;;  %v99_v35 = vmul.f32 %v91_v20, %v45_v2  ;;  %v135_v41 = vrot.slane %v130_v17, %v78_v11  ;;  %v143_v42 = vrot.slane %v130_v17, %v86_v10  ;;  %p237_p6 = pnand %p236_p5, %p230_p2 }
  0x2f   :  { %v147_v46 = vrot.slane %v130_v17, %v90_v12 }
  0x32   :  { %67 = vrot.lane.b32.xlu1 %v45_v2, %s260_s13  ;;  %65 = vrot.lane.b32.xlu0 %v44_v0, %s260_s13 }
  0x98   :  { %v51_v13 = vpop.permute.xlu1 %50  ;;  %v47_v14 = vpop.permute.xlu0 %46 }
  0x9c   :  { %v53_v22 = vpop.permute.xlu1 %52  ;;  %v49_v23 = vpop.permute.xlu0 %48 }
  0x9d   :  { %v57_v25 = vsel %vm56_vm0, %v51_v13, %v53_v22  ;;  %v58_v27 = vsel %vm56_vm0, %v49_v23, %v51_v13  ;;  %v60_v29 = vsel %vm56_vm0, %v53_v22, %v47_v14  ;;  %v59_v32 = vsel %vm56_vm0, %v47_v14, %v49_v23 }
  0x9e   :  { %v123_v30 = vmul.f32 %v109_v16, %v58_v27  ;;  %v124_v36 = vmul.f32 %v113_v21, %v57_v25  ;;  %v125_v39 = vmul.f32 %v117_v24, %v60_v29  ;;  %v122_v43 = vmul.f32 %v105_v26, %v59_v32 }
  0xa0   :  { %v64_v37 = vpop.permute.xlu1 %63  ;;  %v62_v38 = vpop.permute.xlu0 %61  ;;  %v127_v44 = vadd.f32 %v123_v30, %v97_v28  ;;  %v128_v47 = vadd.f32 %v124_v36, %v98_v33  ;;  %v129_v51 = vadd.f32 %v125_v39, %v99_v35  ;;  %v126_v55 = vadd.f32 %v122_v43, %v96_v34 }
  0xa1   :  { %v72_v40 = vsel %vm69_vm1, %v62_v38, %v64_v37 }
  0xa2   :  { %v153_v45 = vmul.f32 %v139_v31, %v72_v40 }
  0xa4   :  { %v157_v48 = vadd.f32 %v153_v45, %v127_v44  ;;  %v68_v49 = vpop.permute.xlu1 %67  ;;  %v66_v50 = vpop.permute.xlu0 %65 }
  0xa5   :  { %v73_v52 = vsel %vm69_vm1, %v68_v49, %v62_v38  ;;  %v70_v53 = vsel %vm69_vm1, %v66_v50, %v68_v49  ;;  %v71_v54 = vsel %vm69_vm1, %v64_v37, %v66_v50 }
  0xa6   :  { %161 = vst [vmem:[#allocation7 + $0x8] sm:$0xff] %v157_v48  ;;  %v152_v56 = vmul.f32 %v135_v41, %v73_v52  ;;  %v154_v57 = vmul.f32 %v143_v42, %v71_v54  ;;  %v155_v58 = vmul.f32 %v147_v46, %v70_v53 }
  0xa8   :  { %v156_v59 = vadd.f32 %v152_v56, %v126_v55  ;;  %v158_v60 = vadd.f32 %v154_v57, %v128_v47  ;;  %v159_v61 = vadd.f32 %v155_v58, %v129_v51 }
  0xaa   :  { %160 = vst [vmem:[#allocation7] sm:$0xff] %v156_v59  ;;  %162 = vst [vmem:[#allocation7 + $0x10] sm:$0xff] %v158_v60 }
  0xab   :  { %163 = vst [vmem:[#allocation7 + $0x18] sm:$0xff] %v159_v61 }
  0xac   :  { %240 = shalt.err (!%p237_p6)
}
  0xad   :  { %s241_s20 = scalar_lea.hbm %s341_s4, 512 }
  0xae   :  { %p242_p7 = scmp.ne.s32.totalorder %s341_s4, %s241_s20  ;;  %p245_p8 = scmp.lt.u32.totalorder %s241_s20, %s341_s4 }
  0xb0   :  { %p247_p9 = pnand %p245_p8, %p242_p7 }
  0xb2   :  { %250 = shalt.err (!%p247_p9)
}
  0xb3   :  { %173 = dma.vmem_to_hbm [thread:$0]  %s171_s3, 512, %s341_s4, [#allocation4]  }
  0xb4   :  { %255 = dma.done.wait [#allocation4], 512  }
  0xb5   :  { %256 = vsyncadd [#allocation4], 4294966784 }
  0xb6   :  { %177 = vsyncpa [#allocation3], 1 }
  0xb7   :  { %178 = vsyncpa [#allocation6], 1 }
  0xb8   :  { %179 = vsyncpa [#allocation4], 1 }

</bundles_post_ra>
